<compile_context>
chip_gen: v6e
topology: v6e:2x2x1
jax: 0.10.0
libtpu: 0.0.40
codegen_flags: <defaults>
</compile_context>

<pallas_src>
import jax
import jax.numpy as jnp
from jax import lax
from jax.experimental import pallas as pl
from jax.experimental.pallas import tpu as pltpu


def _irefxg_zplus_kernel(x_ref, d_ref, w_ref, b_ref, y_ref, a_ref, acc_ref):
    """Grid = (output-unit chunk [parallel], F_in tile [arbitrary/reduction])."""
    f = pl.program_id(1)
    f_tile = w_ref.shape[1]
    off = pl.multiple_of(f * f_tile, f_tile)

    w = w_ref[...]                              # (C, Ft)   weight tile
    x_f = x_ref[:, pl.ds(off, f_tile)]          # (B, Ft)   slice of resident x
    d_f = d_ref[:, pl.ds(off, f_tile)]          # (B, Ft)   slice of resident (x - ref)

    # --- module forward: partial contraction over this F_in tile (no W transpose) ---
    part = lax.dot_general(
        x_f, w,
        dimension_numbers=(((1,), (1,)), ((), ())),
        preferred_element_type=jnp.float32,
    )                                           # (B, C)

    @pl.when(f == 0)
    def _():
        acc_ref[...] = jnp.zeros_like(acc_ref)

    acc_ref[...] += part

    # --- Z+ rule: (Input - Ref) x relu(W), per output unit, for this (chunk, F_in-tile) ---
    # Compute in f32; narrow only at the (store-bound) A write.
    wp = jnp.maximum(w, 0).astype(jnp.float32)
    a_ref[...] = (d_f.astype(jnp.float32)[:, None, :] * wp[None, :, :]).astype(a_ref.dtype)

    @pl.when(f == pl.num_programs(1) - 1)
    def _():
        y_ref[...] = (acc_ref[...] + b_ref[...].astype(jnp.float32)).astype(y_ref.dtype)


def _pick_f_tile(f_in):
    for t in (512, 256, 128):
        if f_in >= t and f_in % t == 0:
            return t
    return f_in  # fallback: full feature dim (legal block: equals the array extent)


def _vmem_limit_bytes(B, F_in, chunk, f_tile, in_dtype, a_dtype, y_dtype):
    """Explicit scoped-VMEM budget for the chosen tiling (double-buffered blocks)."""
    pad = lambda n, m: -(-n // m) * m
    bi = jnp.dtype(in_dtype).itemsize
    ba = jnp.dtype(a_dtype).itemsize
    by = jnp.dtype(y_dtype).itemsize
    est = 0
    est += 2 * 2 * pad(B, 8) * pad(F_in, 128) * bi         # x, d (resident)
    est += 2 * pad(chunk, 8) * pad(f_tile, 128) * bi       # W tile
    est += 2 * pad(1, 8) * pad(chunk, 128) * bi            # bias tile
    est += 2 * pad(B, 8) * pad(chunk, 128) * by            # y tile
    est += 2 * B * pad(chunk, 8) * pad(f_tile, 128) * ba   # A tile (dominant)
    est += pad(B, 8) * pad(chunk, 128) * 4                 # f32 y accumulator scratch
    est += 8 << 20                                         # headroom for compiler internals
    return int(min(max(est, 32 << 20), 100 << 20))


def irefxg_multiply_zplus(x, x_baseline, w, b, *, chunk_size=128, f_tile=None, a_dtype=None):
    B, F_in = x.shape
    F_out = w.shape[0]
    assert w.shape == (F_out, F_in)
    chunk_size = min(chunk_size, F_out)
    assert F_out % chunk_size == 0, "F_out must be a multiple of chunk_size"
    if f_tile is None:
        f_tile = _pick_f_tile(F_in)
    assert F_in % f_tile == 0, "F_in must be a multiple of f_tile"
    n_chunks = F_out // chunk_size
    n_ftiles = F_in // f_tile

    a_dtype = x.dtype if a_dtype is None else jnp.dtype(a_dtype)   # bf16 in -> bf16 A out
    y_dtype = x.dtype

    # Hoisted out of the store-bound kernel loop (tiny XLA ops).
    d = x - x_baseline
    a_bias = jnp.maximum(b, 0.0)[None, :]
    b2d = b.reshape(1, F_out)

    grid_spec = pltpu.PrefetchScalarGridSpec(
        num_scalar_prefetch=0,
        grid=(n_chunks, n_ftiles),
        in_specs=[
            pl.BlockSpec((B, F_in), lambda c, f: (0, 0)),                 # x   (resident)
            pl.BlockSpec((B, F_in), lambda c, f: (0, 0)),                 # d   (resident)
            pl.BlockSpec((chunk_size, f_tile), lambda c, f: (c, f)),      # W tile
            pl.BlockSpec((1, chunk_size), lambda c, f: (0, c)),           # bias chunk
        ],
        out_specs=[
            pl.BlockSpec((B, chunk_size), lambda c, f: (0, c)),               # y (acc across f)
            pl.BlockSpec((B, chunk_size, f_tile), lambda c, f: (0, c, f)),    # A (streamed)
        ],
        scratch_shapes=[pltpu.VMEM((B, chunk_size), jnp.float32)],            # y accumulator
    )

    y, a = pl.pallas_call(
        _irefxg_zplus_kernel,
        grid_spec=grid_spec,
        out_shape=(
            jax.ShapeDtypeStruct((B, F_out), y_dtype),
            jax.ShapeDtypeStruct((B, F_out, F_in), a_dtype),
        ),
        compiler_params=pltpu.CompilerParams(
            dimension_semantics=("parallel", "arbitrary"),
            vmem_limit_bytes=_vmem_limit_bytes(B, F_in, chunk_size, f_tile,
                                               x.dtype, a_dtype, y_dtype),
        ),
    )(x, d, w, b2d)

    return y, a, a_bias


def _reference(x, x_baseline, w, b):
    y = x @ w.T + b[None, :]
    a = (x - x_baseline)[:, None, :] * jnp.maximum(w, 0.0)[None, :, :]
    a_bias = jnp.maximum(b, 0.0)[None, :]
    return y, a, a_bias


if __name__ == "__main__":
    # Small shapes consistent with the module (lane-dense: F_in, F_out multiples of 128).
    B, F_IN, F_OUT, CHUNK, FTILE = 8, 256, 256, 128, 128

    key = jax.random.PRNGKey(0)
    kx, kw, kb = jax.random.split(key, 3)

    x = jax.random.normal(kx, (B, F_IN), dtype=jnp.float32)
    x_baseline = jnp.zeros_like(x)                       # ref_fn: zero baseline
    limit = 1.0 / jnp.sqrt(jnp.float32(F_IN))
    w = jax.random.uniform(kw, (F_OUT, F_IN), jnp.float32, -limit, limit)
    b = jax.random.uniform(kb, (F_OUT,), jnp.float32, -limit, limit)

    # --- f32 run: tight correctness check against the pure-JAX reference ---
    y, a, a_bias = irefxg_multiply_zplus(x, x_baseline, w, b, chunk_size=CHUNK, f_tile=FTILE)
    jax.block_until_ready((y, a, a_bias))

    y_ref, a_ref, ab_ref = _reference(x, x_baseline, w, b)
    assert jnp.allclose(y, y_ref, atol=1e-4, rtol=1e-4)
    assert jnp.allclose(a, a_ref, atol=1e-5, rtol=1e-5)
    assert jnp.allclose(a_bias, ab_ref, atol=1e-6, rtol=1e-6)

    # --- bf16 run: exercises the narrowed (HBM-write-bound) A store path ---
    xb, wb, bb = x.astype(jnp.bfloat16), w.astype(jnp.bfloat16), b.astype(jnp.bfloat16)
    yb, ab, _ = irefxg_multiply_zplus(xb, jnp.zeros_like(xb), wb, bb,
                                      chunk_size=CHUNK, f_tile=FTILE)
    jax.block_until_ready((yb, ab))
    assert ab.dtype == jnp.bfloat16
    y_r16, a_r16, _ = _reference(xb.astype(jnp.float32), jnp.zeros((B, F_IN), jnp.float32),
                                 wb.astype(jnp.float32), bb.astype(jnp.float32))
    assert jnp.allclose(ab.astype(jnp.float32), a_r16, atol=1e-2, rtol=1e-2)
    assert jnp.allclose(yb.astype(jnp.float32), y_r16, atol=5e-2, rtol=5e-2)

    print("KERNEL_OK")
</pallas_src>

<mosaic_0001>
module attributes {stable_mosaic.version = 11 : i64} {
  func.func @_irefxg_zplus_kernel(%arg0: i32, %arg1: i32, %arg2: memref<8x256xf32, #tpu.memory_space<vmem>>, %arg3: memref<8x256xf32, #tpu.memory_space<vmem>>, %arg4: memref<128x128xf32, #tpu.memory_space<vmem>>, %arg5: memref<1x128xf32, #tpu.memory_space<vmem>>, %arg6: memref<8x128xf32, #tpu.memory_space<vmem>>, %arg7: memref<8x128x128xf32, #tpu.memory_space<vmem>>, %arg8: memref<8x128xf32, #tpu.memory_space<vmem>>) attributes {dimension_semantics = [#tpu.dimension_semantics<parallel>, #tpu.dimension_semantics<arbitrary>], iteration_bounds = array<i64: 2, 2>, scalar_prefetch = 0 : i64, scratch_operands = 1 : i64, tpu.core_type = #tpu.core_type<tc>, window_params = [{pipeline_mode = #tpu.pipeline_mode<synchronous>, transform_indices = @transform_0, window_bounds = array<i64: 8, 256>}, {pipeline_mode = #tpu.pipeline_mode<synchronous>, transform_indices = @transform_1, window_bounds = array<i64: 8, 256>}, {transform_indices = @transform_2, window_bounds = array<i64: 128, 128>}, {transform_indices = @transform_3, window_bounds = array<i64: 1, 128>}, {transform_indices = @transform_4, window_bounds = array<i64: 8, 128>}, {transform_indices = @transform_5, window_bounds = array<i64: 8, 128, 128>}]} {
    %c128_i32 = arith.constant 128 : i32
    %0 = arith.muli %arg1, %c128_i32 : i32
    %1 = tpu.assume_multiple %0, 128 : i32
    %c0 = arith.constant 0 : index
    %c0_0 = arith.constant 0 : index
    %2 = vector.load %arg4[%c0, %c0_0] : memref<128x128xf32, #tpu.memory_space<vmem>>, vector<128x128xf32>
    %c0_1 = arith.constant 0 : index
    %3 = arith.index_cast %1 : i32 to index
    %4 = vector.load %arg2[%c0_1, %3] : memref<8x256xf32, #tpu.memory_space<vmem>>, vector<8x128xf32>
    %c0_2 = arith.constant 0 : index
    %5 = arith.index_cast %1 : i32 to index
    %6 = vector.load %arg3[%c0_2, %5] : memref<8x256xf32, #tpu.memory_space<vmem>>, vector<8x128xf32>
    %cst = arith.constant dense<0.000000e+00> : vector<8x128xf32>
    %7 = tpu.matmul %4, %2, %cst {dimension_numbers = #tpu.dot_dimension_numbers<[1], [1], [0], [0], [0, 0, 1, 0], [], []>} : vector<8x128xf32>, vector<128x128xf32>, vector<8x128xf32> -> vector<8x128xf32>
    %c0_i32 = arith.constant 0 : i32
    %8 = arith.cmpi eq, %arg1, %c0_i32 : i32
    %9 = arith.extui %8 : i1 to i32
    %c0_i32_3 = arith.constant 0 : i32
    %10 = arith.cmpi ne, %9, %c0_i32_3 : i32
    scf.if %10 {
      %cst_13 = arith.constant 0.000000e+00 : f32
      %25 = vector.broadcast %cst_13 : f32 to vector<8x128xf32>
      %c0_14 = arith.constant 0 : index
      %c0_15 = arith.constant 0 : index
      %26 = vector.load %arg8[%c0_14, %c0_15] : memref<8x128xf32, #tpu.memory_space<vmem>>, vector<8x128xf32>
      tpu.vector_store %arg8[%c0_14, %c0_15], %25 {strides = array<i32>} : memref<8x128xf32, #tpu.memory_space<vmem>>, vector<8x128xf32>,
    } else {
    }
    %c0_4 = arith.constant 0 : index
    %c0_5 = arith.constant 0 : index
    %11 = vector.load %arg8[%c0_4, %c0_5] : memref<8x128xf32, #tpu.memory_space<vmem>>, vector<8x128xf32>
    %12 = arith.addf %11, %7 : vector<8x128xf32>
    %c0_6 = arith.constant 0 : index
    %c0_7 = arith.constant 0 : index
    %13 = vector.load %arg8[%c0_6, %c0_7] : memref<8x128xf32, #tpu.memory_space<vmem>>, vector<8x128xf32>
    tpu.vector_store %arg8[%c0_6, %c0_7], %12 {strides = array<i32>} : memref<8x128xf32, #tpu.memory_space<vmem>>, vector<8x128xf32>,
    %cst_8 = arith.constant 0.000000e+00 : f32
    %14 = vector.broadcast %cst_8 : f32 to vector<128x128xf32>
    %15 = arith.maximumf %2, %14 : vector<128x128xf32>
    %16 = vector.shape_cast %6 : vector<8x128xf32> to vector<8x1x128xf32>
    %17 = vector.shape_cast %15 : vector<128x128xf32> to vector<1x128x128xf32>
    %18 = vector.broadcast %16 : vector<8x1x128xf32> to vector<8x128x128xf32>
    %19 = vector.broadcast %17 : vector<1x128x128xf32> to vector<8x128x128xf32>
    %20 = arith.mulf %18, %19 : vector<8x128x128xf32>
    %c0_9 = arith.constant 0 : index
    %c0_10 = arith.constant 0 : index
    %c0_11 = arith.constant 0 : index
    %21 = vector.load %arg7[%c0_9, %c0_10, %c0_11] : memref<8x128x128xf32, #tpu.memory_space<vmem>>, vector<8x128x128xf32>
    tpu.vector_store %arg7[%c0_9, %c0_10, %c0_11], %20 {strides = array<i32>} : memref<8x128x128xf32, #tpu.memory_space<vmem>>, vector<8x128x128xf32>,
    %c1_i32 = arith.constant 1 : i32
    %22 = arith.cmpi eq, %arg1, %c1_i32 : i32
    %23 = arith.extui %22 : i1 to i32
    %c0_i32_12 = arith.constant 0 : i32
    %24 = arith.cmpi ne, %23, %c0_i32_12 : i32
    scf.if %24 {
      %c0_13 = arith.constant 0 : index
      %c0_14 = arith.constant 0 : index
      %25 = vector.load %arg8[%c0_13, %c0_14] : memref<8x128xf32, #tpu.memory_space<vmem>>, vector<8x128xf32>
      %c0_15 = arith.constant 0 : index
      %c0_16 = arith.constant 0 : index
      %26 = vector.load %arg5[%c0_15, %c0_16] : memref<1x128xf32, #tpu.memory_space<vmem>>, vector<1x128xf32>
      %27 = vector.broadcast %26 : vector<1x128xf32> to vector<8x128xf32>
      %28 = arith.addf %25, %27 : vector<8x128xf32>
      %c0_17 = arith.constant 0 : index
      %c0_18 = arith.constant 0 : index
      %29 = vector.load %arg6[%c0_17, %c0_18] : memref<8x128xf32, #tpu.memory_space<vmem>>, vector<8x128xf32>
      tpu.vector_store %arg6[%c0_17, %c0_18], %28 {strides = array<i32>} : memref<8x128xf32, #tpu.memory_space<vmem>>, vector<8x128xf32>,
    } else {
    }
    return
  }
  func.func @transform_0(%arg0: i32, %arg1: i32) -> (i32, i32) {
    %c0_i32 = arith.constant 0 : i32
    %c0_i32_0 = arith.constant 0 : i32
    %c0_i32_1 = arith.constant 0 : i32
    return %c0_i32, %c0_i32_0 : i32, i32
  }
  func.func @transform_1(%arg0: i32, %arg1: i32) -> (i32, i32) {
    %c0_i32 = arith.constant 0 : i32
    %c0_i32_0 = arith.constant 0 : i32
    %c0_i32_1 = arith.constant 0 : i32
    return %c0_i32, %c0_i32_0 : i32, i32
  }
  func.func @transform_2(%arg0: i32, %arg1: i32) -> (i32, i32) {
    %c0_i32 = arith.constant 0 : i32
    return %arg0, %arg1 : i32, i32
  }
  func.func @transform_3(%arg0: i32, %arg1: i32) -> (i32, i32) {
    %c0_i32 = arith.constant 0 : i32
    %c0_i32_0 = arith.constant 0 : i32
    return %c0_i32, %arg0 : i32, i32
  }
  func.func @transform_4(%arg0: i32, %arg1: i32) -> (i32, i32) {
    %c0_i32 = arith.constant 0 : i32
    %c0_i32_0 = arith.constant 0 : i32
    return %c0_i32, %arg0 : i32, i32
  }
  func.func @transform_5(%arg0: i32, %arg1: i32) -> (i32, i32, i32) {
    %c0_i32 = arith.constant 0 : i32
    %c0_i32_0 = arith.constant 0 : i32
    return %c0_i32, %arg0, %arg1 : i32, i32, i32
  }
}

</mosaic_0001>

<bundles_post_ra>
// kernel: tpu_custom_call.1
= control target key start
LH: loop header
LB: loop body
LE: loop exit
PB: predicated region body
PF: predicated region fallthrough
CT: control target
= control target key end

     0   :  { %s2300_s0 = inlined_call_operand.hbm [shape: f32[8,256], index: 0, kind: input, shape index: {}]   ;;  %s2301_s1 = inlined_call_operand.hbm [shape: f32[8,256], index: 1, kind: input, shape index: {}]   ;;  %s2302_s2 = inlined_call_operand.hbm [shape: f32[256,256], index: 2, kind: input, shape index: {}]   ;;  %s2303_s3 = inlined_call_operand.hbm [shape: f32[1,256], index: 3, kind: input, shape index: {}]   ;;  %s2304_s4 = inlined_call_operand.hbm [shape: f32[8,256], index: 4, kind: output, shape index: {0}]   ;;  %s2305_s5 = inlined_call_operand.hbm [shape: f32[8,256,256], index: 5, kind: output, shape index: {1}]  }
   0x1   :  { %2325 = sst [smem:[#allocation30_spill]] %s2300_s0 }
   0x2   :  { %2326 = sst [smem:[#allocation31_spill]] %s2301_s1 }
   0x3   :  { %2327 = sst [smem:[#allocation32_spill]] %s2304_s4 }
   0x4   :  { %2328 = sst [smem:[#allocation33_spill]] %s2305_s5 }
   0x5   :  { %11 = vsyncpa [#allocation4], 0 }
   0x6   :  { %12 = vsyncpa [#allocation7], 0 }
   0x7   :  { %13 = vsyncpa [#allocation5], 0 }
   0x8   :  { %15 = vsyncpa [#allocation5 + $0x1], 0 }
   0x9   :  { %16 = vsyncpa [#allocation12], 0 }
   0xa   :  { %18 = vsyncpa [#allocation12 + $0x1], 0  ;;  %s1559_s18 = smov 0   ;;  %s1561_s19 = smov 0  }
   0xb   :  { %s1563_s20 = smov 0   ;;  %s1565_s21 = smov 0  }
   0xc   :  { %s1567_s22 = smov 0   ;;  %s1569_s23 = smov 0  }
   0xd   :  { %s1571_s24 = smov 0   ;;  %s1573_s25 = smov 0  }
   0xe   :  { %s1575_s26 = smov 0   ;;  %s1577_s27 = smov 0  }
   0xf   :  { %s1579_s28 = smov 0  }
  0x10 LB: > { %2329 = sst [smem:[#allocation21_spill]] %s1467_s18  ;;  %s1615_s29 = sadd.s32 4294967295, %s1507_s28   ;;  %s1507_s28 = sphi %s1579_s28, %s24_s28   ;;  %s1503_s27 = sphi %s1577_s27, %s2387_s27   ;;  %s1499_s26 = sphi %s1575_s26, %s2386_s26   ;;  %s1495_s25 = sphi %s1573_s25, %s2385_s25   ;;  %s1491_s24 = sphi %s1571_s24, %s2384_s24   ;;  %s1487_s23 = sphi %s1569_s23, %s2383_s23   ;;  %s1483_s22 = sphi %s1567_s22, %s2382_s22   ;;  %s1479_s21 = sphi %s1565_s21, %s2381_s21   ;;  %s1475_s20 = sphi %s1563_s20, %s2380_s20   ;;  %s1471_s19 = sphi %s1561_s19, %s2379_s19   ;;  %s1467_s18 = sphi %s1559_s18, %s2378_s18  }
  0x11   : > { %2330 = sst [smem:[#allocation22_spill]] %s1479_s21  ;;  %s1025_s30 = sadd.s32 4294967294, %s1507_s28  }
  0x12   : > { %2331 = sst [smem:[#allocation23_spill]] %s1491_s24  ;;  %p94_p0 = scmp.ne.s32.totalorder %s1487_s23, %s1483_s22 }
  0x13   : > { %2332 = sst [smem:[#allocation24_spill]] %s1495_s25  ;;  %p2306_p1 = scmp.eq.s32.totalorder %s1507_s28, 0 }
  0x14   : > { %p100_p2 = scmp.ne.s32.totalorder %s1483_s22, %s1479_s21  ;;  %p2307_p3 = scmp.eq.s32.totalorder %s1615_s29, 0 }
  0x15   : > { %p126_p4 = scmp.ne.s32.totalorder %s1471_s19, %s1467_s18  ;;  %p1628_p5 = por %p2306_p1, %p94_p0 }
  0x16   : > { %p2308_p6 = scmp.eq.s32.totalorder %s1615_s29, 3  ;;  %p1635_p7 = por %p2307_p3, %p100_p2 }
  0x17   : > { %p1641_p8 = por %p126_p4, %p2307_p3  ;;  %p156_p9 = scmp.eq.s32.totalorder %s1025_s30, 3 }
  0x18   : > { %s2334_s7 = scalar_select %p1635_p7, 1, 0 }
  0x19   : > { %s2336_s8 = scalar_select %p1641_p8, 1, 0 }
  0x1a   : > { %2335 = sst [smem:[#allocation25_spill]] %s2334_s7  ;;  %p1647_p10 = por %p2308_p6, %p94_p0 }
  0x1b   : > { %2337 = sst [smem:[#allocation26_spill]] %s2336_s8  ;;  %p1026_p11 = scmp.ge.s32.totalorder %s1507_s28, 1 }
  0x1c   : > { %s2338_s9 = scalar_select %p1647_p10, 1, 0 }
  0x1d   : > { %p191_p12 = scmp.lt.s32.totalorder %s1507_s28, 5  ;;  %p1653_p13 = por %p156_p9, %p126_p4 }
  0x1e   : > { %2339 = sst [smem:[#allocation27_spill]] %s2338_s9  ;;  %p1657_p1 = por %p156_p9, %p100_p2 }
  0x1f   : > { %s2340_s10 = scalar_select %p1653_p13, 1, 0 }
  0x20   : > { %s2342_s11 = scalar_select %p1657_p1, 1, 0 }
  0x21   : > { %2341 = sst [smem:[#allocation28_spill]] %s2340_s10  ;;  %p1661_p3 = pnand %p1026_p11, %p191_p12 }
  0x22   : > { %2343 = sst [smem:[#allocation29_spill]] %s2342_s11  ;;  %s1509_s13 = smov [#allocation3]  }
  0x23   : > { %p1131_p0 = pneg %p1661_p3  ;;  %s204_s14 = sshll.u32 %s1509_s13, 4  ;;  %s205_s14 = int_to_ptr.vmem [resolvable:$true] %s204_s14 }
  0x24   : > { %p2324_p6 = scmp.lt.s32.totalorder %s1507_s28, 4  ;;  %p2345_p4 = scmp.eq.s32.totalorder %s1615_s29, 0 }
  0x25   : > { %s1274_s30 = scalar_lea.vmem %s205_s14, 256 }
  0x26   : > { %p1671_p10 = pnand %p1131_p0, %p2345_p4  ;;  %p1679_p2 = pnand %p2324_p6, %p1628_p5 }
  0x27   : > { %p1275_p11 = scmp.ne.s32.totalorder %s205_s14, %s1274_s30  ;;  %p1282_p0 = scmp.lt.s32.totalorder %s205_s14, %s205_s14 }
  0x28   : > { %p1265_p9 = pneg %p1671_p10  ;;  %p1283_p4 = scmp.lt.s32.totalorder %s1274_s30, %s1274_s30 }
  0x2a   : > { %p1277_p12 = pnand %p1275_p11, %p1265_p9  ;;  %p1284_p13 = por %p1283_p4, %p1282_p0 }
  0x2c   : > { %p1278_p1 = pneg %p1277_p12 }
  0x2e   : > { %p1285_p8 = pnand %p1284_p13, %p1278_p1 }
  0x30   : > { %1288 = shalt.err (!%p1285_p8)
}
  0x31   : > { %s2348_s0 = sld [smem:[#allocation30_spill]]  ;;  %s33_s15 = sadd.s32 1, %s1499_s26 }
  0x32   : > { %p1694_p5 = scmp.ge.s32.totalorder %s33_s15, 2  ;;  %s226_s30 = sand.u32 1, %s1507_s28  }
  0x33   : > { %s228_s21 = sand.u32 1, %s1487_s23   ;;  %s1055_s10 = sshll.u32 %s1503_s27, 5 }
  0x34   : > { %s2389_s15 = smov (%p1694_p5, %s33_s15), 0  ;;  %s1030_s6 = sshll.u32 %s228_s21, 7 }
  0x35   : > { %s236_s13 = sadd.s32 %s1499_s26, %s1055_s10  ;;  %s230_s5 = scalar_lea.vmem [#allocation8], %s1030_s6 }
  0x36   : > { %s1033_s18 = sshll.u32 %s236_s13, 7  ;;  %s239_s9 = sshll.u32 %s230_s5, 4  ;;  %s240_s9 = int_to_ptr.vmem [resolvable:$true] %s239_s9 }
  0x37   : > { %1134 = dma.hbm_to_vmem [thread:$0]  (!%p1671_p10), %s2348_s0, 256, %s205_s14, [#allocation4]  }
  0x38   : > { %s238_s14 = scalar_lea.hbm %s2302_s2, %s1033_s18  ;;  %s1709_s0 = scalar_lea.sflag [#allocation4], %s226_s30 }
  0x39   : > { %p1291_p1 = pneg %p1679_p2  ;;  %s1302_s24 = scalar_lea.vmem %s240_s9, 2048 }
  0x3a   : > { %p1303_p8 = scmp.ne.s32.totalorder %s240_s9, %s1302_s24  ;;  %s1510_s8 = smov [#allocation8]  }
  0x3b   : > { %s1307_s7 = sshll.u32 %s1510_s8, 4  ;;  %s1308_s7 = int_to_ptr.vmem [resolvable:$false] %s1307_s7 }
  0x3c   : > { %p1305_p13 = pnand %p1303_p8, %p1291_p1  ;;  %s1309_s21 = scalar_lea.vmem %s1308_s7, 4096 }
  0x3d   : > { %p1310_p12 = scmp.lt.s32.totalorder %s240_s9, %s1308_s7  ;;  %p1311_p0 = scmp.lt.s32.totalorder %s1309_s21, %s1302_s24 }
  0x3e   : > { %p1306_p11 = pneg %p1305_p13 }
  0x3f   : > { %p1312_p4 = por %p1311_p0, %p1310_p12 }
  0x41   : > { %p1313_p6 = pnand %p1312_p4, %p1306_p11 }
  0x43   : > { %1316 = shalt.err (!%p1313_p6)
}
  0x44   : > { %s1511_s4 = smov 256   ;;  %s1512_s5 = smov 128  }
  0x45   : > { %s1513_s18 = smov 8   ;;  %s1514_s25 = smov [#allocation6]  }
  0x46   : > { %1141 = dma.hbm_to_vmem [thread:$0]  (!%p1679_p2), %s238_s14, 2048, %s240_s9, %s1709_s0, %s1511_s4, %s1512_s5, %s1513_s18  }
  0x47   : > { %s215_s10 = sshll.u32 %s1514_s25, 4  ;;  %s216_s10 = int_to_ptr.vmem [resolvable:$true] %s215_s10 }
  0x48   : > { %s1328_s30 = scalar_lea.vmem %s216_s10, 256  ;;  %p1336_p12 = scmp.lt.s32.totalorder %s216_s10, %s216_s10 }
  0x49   : > { %p1329_p1 = scmp.ne.s32.totalorder %s216_s10, %s1328_s30  ;;  %p1337_p11 = scmp.lt.s32.totalorder %s1328_s30, %s1328_s30 }
  0x4b   : > { %p1331_p8 = pnand %p1329_p1, %p1265_p9  ;;  %p1338_p6 = por %p1337_p11, %p1336_p12 }
  0x4d   : > { %p1332_p13 = pneg %p1331_p8 }
  0x4f   : > { %p1339_p0 = pnand %p1338_p6, %p1332_p13 }
  0x51   : > { %1342 = shalt.err (!%p1339_p0)
}
  0x52   : > { %s2350_s1 = sld [smem:[#allocation31_spill]]  ;;  %s83_s8 = ssub.s32 %s1499_s26, %s2389_s15 }
  0x53   : > { %s36_s9 = sadd.s32 1, %s1503_s27  ;;  %p120_p2 = scmp.ne.s32.totalorder %s1475_s20, %s1471_s19 }
  0x54   : > { %s2391_s9 = smov (!%p1694_p5, %s36_s9), %s1503_s27  ;;  %s251_s16 = sand.u32 1, %s1475_s20  }
  0x55   : > { %p38_p9 = scmp.ge.s32.totalorder %s2391_s9, 2  ;;  %s113_s17 = sadd.s32 1, %s1475_s20 }
  0x56   : > { %p2351_p4 = scmp.eq.s32.totalorder %s1615_s29, 3  ;;  %s1034_s11 = sshll.u32 %s1503_s27, 4 }
  0x57   : > { %s2393_s9 = smov (%p38_p9, %s2391_s9), 0  ;;  %s252_s14 = scalar_lea.vmem [#allocation9], %s251_s16 }
  0x58   : > { %1137 = dma.hbm_to_vmem [thread:$0]  (!%p1671_p10), %s2350_s1, 256, %s216_s10, [#allocation7]  }
  0x59   : > { %p1736_p1 = por %p2351_p4, %p120_p2  ;;  %p2353_p10 = scmp.eq.s32.totalorder %s1507_s28, 0 }
  0x5a   : > { %s82_s13 = ssub.s32 %s1503_s27, %s2393_s9  ;;  %s259_s21 = sshll.u32 %s252_s14, 4  ;;  %s260_s21 = int_to_ptr.vmem [resolvable:$true] %s259_s21 }
  0x5b   : > { %p122_p8 = por %p120_p2, %p2353_p10  ;;  %s84_s4 = sor.u32 %s83_s8, %s82_s13 }
  0x5c   : > { %p111_p5 = scmp.eq.s32.totalorder %s82_s13, 0  ;;  %p85_p13 = scmp.eq.s32.totalorder %s84_s4, 0 }
  0x5d   : > { %s257_s25 = scalar_lea.hbm %s2303_s3, %s1034_s11  ;;  %s2354_s30 = sadd.s32 1, %s1487_s23 }
  0x5e   : > { %s1751_s10 = scalar_select %p111_p5, %s1475_s20, %s113_s17  }
  0x5f   : > { %s1756_s24 = scalar_select %p85_p13, %s1487_s23, %s2354_s30  }
  0x60   : > { %p2355_p12 = scmp.lt.s32.totalorder %s1507_s28, 4  ;;  %s1356_s8 = scalar_lea.vmem %s260_s21, 16 }
  0x61   : > { %p1357_p0 = scmp.ne.s32.totalorder %s260_s21, %s1356_s8  ;;  %s1515_s16 = smov [#allocation9]  }
  0x62   : > { %p1760_p11 = pnand %p2355_p12, %p122_p8  ;;  %s1361_s11 = sshll.u32 %s1515_s16, 4  ;;  %s1362_s11 = int_to_ptr.vmem [resolvable:$false] %s1361_s11 }
  0x63   : > { %s1363_s17 = scalar_lea.vmem %s1362_s11, 32  ;;  %p1364_p4 = scmp.lt.s32.totalorder %s260_s21, %s1362_s11 }
  0x64   : > { %p1345_p6 = pneg %p1760_p11  ;;  %p1365_p10 = scmp.lt.s32.totalorder %s1363_s17, %s1356_s8 }
  0x66   : > { %p1359_p2 = pnand %p1357_p0, %p1345_p6  ;;  %p1366_p5 = por %p1365_p10, %p1364_p4 }
  0x68   : > { %p1360_p9 = pneg %p1359_p2 }
  0x6a   : > { %p1367_p13 = pnand %p1366_p5, %p1360_p9 }
  0x6c   : > { %1370 = shalt.err (!%p1367_p13)
}
  0x6d   : > { %1144 = dma.hbm_to_vmem [thread:$0]  (!%p1760_p11), %s257_s25, 16, %s260_s21, %s1709_s0  }
  0x6e   : > { %268 = sbr.rel (%p1661_p3) target bundleno = 519 (0x207), region = 36  ;;  %p2357_p8 = scmp.eq.s32.totalorder (!%p1661_p3), %s1615_s29, 0 }
  0x73   : > { %1442 = dma.done.wait (%p2357_p8), [#allocation4], 256   ;;  %p2358_p12 = pmov %p2357_p8 }
  0x74   : > { %p2359_p6 = pmov %p2357_p8 }
  0x75   : > { %1444 = vsyncadd (%p2358_p12), [#allocation4], 4294967040 }
  0x76   : > { %1446 = dma.done.wait (%p2359_p6), [#allocation7], 256   ;;  %p2360_p0 = pmov %p2359_p6 }
  0x77   : > { %s278_s14 = sand.u32 1, %s1615_s29   ;;  %s1781_s0 = sand.u32 1, %s1483_s22  }
  0x78   : > { %1448 = vsyncadd (%p2360_p0), [#allocation7], 4294967040  ;;  %s1038_s12 = sshll.u32 %s1781_s0, 7  ;;  %s279_s21 = scalar_lea.sflag [#allocation4], %s278_s14 }
  0x79   : > { %s1784_s4 = scalar_lea.vmem [#allocation8], %s1038_s12 }
  0x7a   : > { %1450 = dma.done.wait (%p1635_p7), %s279_s21, 2048  }
  0x7b   : > { %1452 = vsyncadd (%p1635_p7), %s279_s21, 4294965248  ;;  %s2362_s5 = sld [smem:[#allocation26_spill]]  ;;  %s1791_s18 = sand.u32 1, %s1471_s19  }
  0x7c   : > { %s290_s25 = scalar_lea.vmem [#allocation9], %s1791_s18 }
  0x81   : > { %p2363_p3 = scmp.ne.s32.totalorder %s2362_s5, 0 }
  0x83   : > { %1454 = dma.done.wait (%p2363_p3), %s279_s21, 16  }
  0x84   : > { %1456 = vsyncadd (%p2363_p3), %s279_s21, 4294967280  ;;  %s2364_s29 = sld [smem:[#allocation23_spill]]  ;;  %s1039_s30 = sshll.u32 %s1791_s18, 3  ;;  %v1516_v0 = vmov 0.0   ;;  %vm1517_vm0 = vmmov 0   ;;  %v1804_v1 = vld [vmem:[%s1784_s4 + $0x78] sm:$0xff] }
  0x85   : > { %s1040_s7 = sshll.u32 %s1781_s0, 10  ;;  %1074 = vmatprep.subr.mxu0 %v1516_v0  ;;  %1106 = vmatprep.mubr.msk.f32.mxu0 %vm1517_vm0, %v1516_v0  ;;  %v1809_v2 = vld [vmem:[%s1784_s4 + $0x70] sm:$0xff]  ;;  %v1817_v4 = vld [vmem:[%s1784_s4 + $0x68] sm:$0xff]  ;;  %v1821_v5 = vld [vmem:[%s1784_s4 + $0x60] sm:$0xff]  ;;  %s1846_s14 = scalar_lea.vmem [#allocation10], %s1039_s30 }
  0x86   : > { %1075 = vmatpush3.xpose.msra.mxu0 %v1804_v1  ;;  %v1825_v6 = vld [vmem:[%s1784_s4 + $0x58] sm:$0xff]  ;;  %v1829_v7 = vld [vmem:[%s1784_s4 + $0x50] sm:$0xff]  ;;  %v338_v8 = vld [vmem:[%s1784_s4 + $0x48] sm:$0xff]  ;;  %s1850_s12 = scalar_lea.vmem [#allocation11], %s1040_s7 }
  0x87   : > { %1076 = vmatprep.subr.mxu0 %v1516_v0  ;;  %v337_v9 = vld [vmem:[%s1784_s4 + $0x40] sm:$0xff]  ;;  %v336_v10 = vld [vmem:[%s1784_s4 + $0x38] sm:$0xff]  ;;  %v335_v11 = vld [vmem:[%s1784_s4 + $0x30] sm:$0xff] }
  0x88   : > { %v334_v12 = vld [vmem:[%s1784_s4 + $0x28] sm:$0xff]  ;;  %v333_v13 = vld [vmem:[%s1784_s4 + $0x20] sm:$0xff]  ;;  %v332_v14 = vld [vmem:[%s1784_s4 + $0x18] sm:$0xff] }
  0x89   : > { %v331_v15 = vld [vmem:[%s1784_s4 + $0x10] sm:$0xff]  ;;  %v330_v16 = vld [vmem:[%s1784_s4 + $0x8] sm:$0xff]  ;;  %v329_v17 = vld [vmem:[%s1784_s4] sm:$0xff] }
  0x8a   : > { %s1041_s8 = sshll.u32 %s2364_s29, 7  ;;  %1077 = vmatpush3.xpose.msra.mxu0 %v1809_v2  ;;  %p1044_p7 = scmp.ne.s32.totalorder %s2364_s29, 0 }
  0x8b   : > { %s1801_s16 = sshra.s32 %s1041_s8, 7  ;;  %1078 = vmatprep.subr.mxu0 %v1516_v0 }
  0x8c   : > { %s1042_s11 = sshll.u32 %s1801_s16, 3 }
  0x8d   : > { %s351_s17 = scalar_lea.vmem [#allocation6], %s1042_s11  ;;  %s348_s13 = scalar_lea.vmem [#allocation3], %s1042_s11 }
  0x8e   : > { %v1814_v3 = vld [vmem:[%s351_s17] sm:$0xff]  ;;  %1079 = vmatpush3.xpose.msra.mxu0 %v1817_v4 }
  0x8f   : > { %1080 = vmatprep.subr.mxu0 %v1516_v0  ;;  %v349_v18 = vld [vmem:[%s348_s13] sm:$0xff] }
  0x92   : > { %1081 = vmatpush3.xpose.msra.mxu0 %v1821_v5 }
  0x93   : > { %1082 = vmatprep.subr.mxu0 %v1516_v0 }
  0x96   : > { %1083 = vmatpush3.xpose.msra.mxu0 %v1825_v6 }
  0x97   : > { %1084 = vmatprep.subr.mxu0 %v1516_v0 }
  0x9a   : > { %1085 = vmatpush3.xpose.msra.mxu0 %v1829_v7 }
  0x9b   : > { %1086 = vmatprep.subr.mxu0 %v1516_v0 }
  0x9e   : > { %1087 = vmatpush3.xpose.msra.mxu0 %v338_v8 }
  0x9f   : > { %1088 = vmatprep.subr.mxu0 %v1516_v0 }
  0xa2   : > { %1089 = vmatpush3.xpose.msra.mxu0 %v337_v9 }
  0xa3   : > { %1090 = vmatprep.subr.mxu0 %v1516_v0 }
  0xa6   : > { %1091 = vmatpush3.xpose.msra.mxu0 %v336_v10 }
  0xa7   : > { %1092 = vmatprep.subr.mxu0 %v1516_v0 }
  0xaa   : > { %1093 = vmatpush3.xpose.msra.mxu0 %v335_v11 }
  0xab   : > { %1094 = vmatprep.subr.mxu0 %v1516_v0 }
  0xae   : > { %1095 = vmatpush3.xpose.msra.mxu0 %v334_v12 }
  0xaf   : > { %1096 = vmatprep.subr.mxu0 %v1516_v0 }
  0xb2   : > { %1097 = vmatpush3.xpose.msra.mxu0 %v333_v13 }
  0xb3   : > { %1098 = vmatprep.subr.mxu0 %v1516_v0 }
  0xb6   : > { %1099 = vmatpush3.xpose.msra.mxu0 %v332_v14 }
  0xb7   : > { %1100 = vmatprep.subr.mxu0 %v1516_v0 }
  0xba   : > { %1101 = vmatpush3.xpose.msra.mxu0 %v331_v15 }
  0xbb   : > { %1102 = vmatprep.subr.mxu0 %v1516_v0 }
  0xbe   : > { %1103 = vmatpush3.xpose.msra.mxu0 %v330_v16 }
  0xbf   : > { %1104 = vmatprep.subr.mxu0 %v1516_v0 }
  0xc2   : > { %1105 = vmatpush3.xpose.msra.mxu0 %v329_v17 }
  0xc5   : > { %1107 = vmatmul.mubr.f32.vlgmr.msra.gmra.mxu0 %v349_v18 }
 0x183   : > { %426 = sbr.rel (%p1044_p7) target bundleno = 394 (0x18a), region = 56 }
 0x185   : > { %v419_v19 = vpop.f32.mrf.mxu0 }
 0x187   : > { %v1108_v20 = vpop.f32.mrf.mxu0 }
 0x188   : > { %v1518_v21 = vmov 0.0  }
 0x189   : > { %427 = vst [vmem:[#allocation2] sm:$0xff] %v1518_v21 }
 0x18a PF: > { %v452_v23 = vlaneseq  ;;  %v1519_v25 = vmov 1966171168   ;;  %v1853_v29 = vmax.f32 %v329_v17, 0.0  ;;  %v1855_v31 = vmax.f32 %v330_v16, 0.0  ;;  %s2365_s21 = sld [smem:[#allocation23_spill]] }
 0x18b   : > { %v450_v26 = vunpack.c.l.s4 %v1519_v25  ;;  %v1857_v32 = vmax.f32 %v331_v15, 0.0  ;;  %v1859_v33 = vmax.f32 %v332_v14, 0.0  ;;  %v1861_v34 = vmax.f32 %v333_v13, 0.0 }
 0x18c   : > { %v453_v27 = vshrl.u32 %v452_v23, 7  ;;  %v448_v35 = vcombine.high %v1814_v3, %v1814_v3  ;;  %v1868_v38 = vmax.f32 %v334_v12, 0.0  ;;  %v1870_v39 = vmax.f32 %v335_v11, 0.0 }
 0x18d   : > { %v451_v28 = vunpack.c.0.s8 %v450_v26  ;;  %v1872_v40 = vmax.f32 %v336_v10, 0.0  ;;  %v1874_v41 = vmax.f32 %v337_v9, 0.0  ;;  %v1876_v42 = vmax.f32 %v338_v8, 0.0 }
 0x18e   : > { %v1866_v37 = vsub.s32 0, %v453_v27  ;;  %v1879_v45 = vmax.f32 %v1829_v7, 0.0  ;;  %v1882_v46 = vmax.f32 %v1825_v6, 0.0  ;;  %v1885_v48 = vmax.f32 %v1821_v5, 0.0 }
 0x18f   : > { %v454_v30 = vsub.s32 %v451_v28, %v453_v27  ;;  %v1888_v49 = vmax.f32 %v1817_v4, 0.0  ;;  %v1894_v53 = vmax.f32 %v1809_v2, 0.0  ;;  %v1897_v54 = vmax.f32 %v1804_v1, 0.0 }
 0x190   : > { %v428_v22 = vld [vmem:[#allocation2] sm:$0xff]  ;;  %p1045_p11 = scmp.ne.s32.totalorder %s2365_s21, 1 }
 0x191   : > { %v429_v24 = vadd.f32 %v428_v22, %v419_v19  ;;  %v455_v36 = vrot.slane %v1814_v3, %v454_v30  ;;  %v462_v43 = vrot.slane %v448_v35, %v454_v30 }
 0x193   : > { %430 = vst [vmem:[#allocation2] sm:$0xff] %v429_v24  ;;  %v471_v44 = vrot.slane %v455_v36, %v454_v30  ;;  %v463_v47 = vcombine.high %v455_v36, %v455_v36  ;;  %v1890_v50 = vrot.slane %v462_v43, %v454_v30  ;;  %v464_v51 = vcombine.high %v462_v43, %v462_v43 }
 0x195   : > { %v500_v52 = vrot.slane %v471_v44, %v1866_v37  ;;  %v1899_v55 = vrot.slane %v463_v47, %v454_v30  ;;  %v493_v56 = vcombine.high %v471_v44, %v471_v44  ;;  %v1903_v57 = vrot.slane %v1890_v50, %v1866_v37 }
 0x196   : > { %v1905_v58 = vrot.slane %v464_v51, %v454_v30  ;;  %v494_v59 = vcombine.high %v1890_v50, %v1890_v50 }
 0x197   : > { %v537_v60 = vmul.f32 %v500_v52, %v1853_v29  ;;  %v538_v61 = vmul.f32 %v500_v52, %v1855_v31  ;;  %v539_v62 = vmul.f32 %v500_v52, %v1857_v32  ;;  %v540_v63 = vmul.f32 %v500_v52, %v1859_v33 }
 0x198   : > { %v541_v0 = vmul.f32 %v500_v52, %v1861_v34  ;;  %v542_v1 = vmul.f32 %v500_v52, %v1868_v38  ;;  %v543_v2 = vmul.f32 %v500_v52, %v1870_v39  ;;  %v544_v3 = vmul.f32 %v500_v52, %v1872_v40 }
 0x199   : > { %665 = vst [vmem:[%s1850_s12] sm:$0xff] %v537_v60  ;;  %666 = vst [vmem:[%s1850_s12 + $0x8] sm:$0xff] %v538_v61  ;;  %v545_v4 = vmul.f32 %v500_v52, %v1874_v41  ;;  %v546_v5 = vmul.f32 %v500_v52, %v1876_v42  ;;  %v547_v6 = vmul.f32 %v500_v52, %v1879_v45 }
 0x19a   : > { %667 = vst [vmem:[%s1850_s12 + $0x10] sm:$0xff] %v539_v62  ;;  %668 = vst [vmem:[%s1850_s12 + $0x18] sm:$0xff] %v540_v63  ;;  %v548_v7 = vmul.f32 %v500_v52, %v1882_v46  ;;  %v549_v8 = vmul.f32 %v500_v52, %v1885_v48  ;;  %v550_v9 = vmul.f32 %v500_v52, %v1888_v49 }
 0x19b   : > { %669 = vst [vmem:[%s1850_s12 + $0x20] sm:$0xff] %v541_v0  ;;  %670 = vst [vmem:[%s1850_s12 + $0x28] sm:$0xff] %v542_v1  ;;  %v551_v10 = vmul.f32 %v500_v52, %v1894_v53  ;;  %v552_v11 = vmul.f32 %v500_v52, %v1897_v54  ;;  %v504_v12 = vrot.slane %v1899_v55, %v1866_v37 }
 0x19c   : > { %671 = vst [vmem:[%s1850_s12 + $0x30] sm:$0xff] %v543_v2  ;;  %672 = vst [vmem:[%s1850_s12 + $0x38] sm:$0xff] %v544_v3  ;;  %v1940_v13 = vrot.slane %v493_v56, %v1866_v37  ;;  %v495_v14 = vcombine.high %v1899_v55, %v1899_v55  ;;  %v601_v15 = vmul.f32 %v1903_v57, %v1853_v29 }
 0x19d   : > { %673 = vst [vmem:[%s1850_s12 + $0x40] sm:$0xff] %v545_v4  ;;  %674 = vst [vmem:[%s1850_s12 + $0x48] sm:$0xff] %v546_v5  ;;  %v602_v16 = vmul.f32 %v1903_v57, %v1855_v31  ;;  %v603_v17 = vmul.f32 %v1903_v57, %v1857_v32  ;;  %v604_v18 = vmul.f32 %v1903_v57, %v1859_v33 }
 0x19e   : > { %675 = vst [vmem:[%s1850_s12 + $0x50] sm:$0xff] %v547_v6  ;;  %676 = vst [vmem:[%s1850_s12 + $0x58] sm:$0xff] %v548_v7  ;;  %v605_v19 = vmul.f32 %v1903_v57, %v1861_v34  ;;  %v553_v20 = vmul.f32 %v504_v12, %v1853_v29  ;;  %v554_v21 = vmul.f32 %v504_v12, %v1855_v31 }
 0x19f   : > { %677 = vst [vmem:[%s1850_s12 + $0x60] sm:$0xff] %v549_v8  ;;  %678 = vst [vmem:[%s1850_s12 + $0x68] sm:$0xff] %v550_v9  ;;  %v555_v22 = vmul.f32 %v504_v12, %v1857_v32  ;;  %v556_v23 = vmul.f32 %v504_v12, %v1859_v33  ;;  %v557_v24 = vmul.f32 %v504_v12, %v1861_v34 }
 0x1a0   : > { %679 = vst [vmem:[%s1850_s12 + $0x70] sm:$0xff] %v551_v10  ;;  %680 = vst [vmem:[%s1850_s12 + $0x78] sm:$0xff] %v552_v11  ;;  %v558_v25 = vmul.f32 %v504_v12, %v1868_v38  ;;  %v559_v26 = vmul.f32 %v504_v12, %v1870_v39  ;;  %v560_v27 = vmul.f32 %v504_v12, %v1872_v40 }
 0x1a1   : > { %729 = vst [vmem:[%s1850_s12 + $0x200] sm:$0xff] %v601_v15  ;;  %730 = vst [vmem:[%s1850_s12 + $0x208] sm:$0xff] %v602_v16  ;;  %v561_v28 = vmul.f32 %v504_v12, %v1874_v41  ;;  %v562_v30 = vmul.f32 %v504_v12, %v1876_v42  ;;  %v563_v35 = vmul.f32 %v504_v12, %v1879_v45 }
 0x1a2   : > { %731 = vst [vmem:[%s1850_s12 + $0x210] sm:$0xff] %v603_v17  ;;  %732 = vst [vmem:[%s1850_s12 + $0x218] sm:$0xff] %v604_v18  ;;  %v564_v36 = vmul.f32 %v504_v12, %v1882_v46  ;;  %v565_v43 = vmul.f32 %v504_v12, %v1885_v48  ;;  %v566_v44 = vmul.f32 %v504_v12, %v1888_v49 }
 0x1a3   : > { %733 = vst [vmem:[%s1850_s12 + $0x220] sm:$0xff] %v605_v19  ;;  %681 = vst [vmem:[%s1850_s12 + $0x80] sm:$0xff] %v553_v20  ;;  %v567_v47 = vmul.f32 %v504_v12, %v1894_v53  ;;  %v568_v51 = vmul.f32 %v504_v12, %v1897_v54  ;;  %v569_v52 = vmul.f32 %v1940_v13, %v1853_v29 }
 0x1a4   : > { %682 = vst [vmem:[%s1850_s12 + $0x88] sm:$0xff] %v554_v21  ;;  %683 = vst [vmem:[%s1850_s12 + $0x90] sm:$0xff] %v555_v22  ;;  %v570_v56 = vmul.f32 %v1940_v13, %v1855_v31  ;;  %v571_v60 = vmul.f32 %v1940_v13, %v1857_v32  ;;  %v572_v61 = vmul.f32 %v1940_v13, %v1859_v33 }
 0x1a5   : > { %684 = vst [vmem:[%s1850_s12 + $0x98] sm:$0xff] %v556_v23  ;;  %685 = vst [vmem:[%s1850_s12 + $0xa0] sm:$0xff] %v557_v24  ;;  %v573_v62 = vmul.f32 %v1940_v13, %v1861_v34  ;;  %v574_v63 = vmul.f32 %v1940_v13, %v1868_v38  ;;  %v575_v0 = vmul.f32 %v1940_v13, %v1870_v39 }
 0x1a6   : > { %686 = vst [vmem:[%s1850_s12 + $0xa8] sm:$0xff] %v558_v25  ;;  %687 = vst [vmem:[%s1850_s12 + $0xb0] sm:$0xff] %v559_v26  ;;  %v576_v1 = vmul.f32 %v1940_v13, %v1872_v40  ;;  %v577_v2 = vmul.f32 %v1940_v13, %v1874_v41  ;;  %v578_v3 = vmul.f32 %v1940_v13, %v1876_v42 }
 0x1a7   : > { %688 = vst [vmem:[%s1850_s12 + $0xb8] sm:$0xff] %v560_v27  ;;  %689 = vst [vmem:[%s1850_s12 + $0xc0] sm:$0xff] %v561_v28  ;;  %v579_v4 = vmul.f32 %v1940_v13, %v1879_v45  ;;  %v580_v5 = vmul.f32 %v1940_v13, %v1882_v46  ;;  %v581_v6 = vmul.f32 %v1940_v13, %v1885_v48 }
 0x1a8   : > { %690 = vst [vmem:[%s1850_s12 + $0xc8] sm:$0xff] %v562_v30  ;;  %691 = vst [vmem:[%s1850_s12 + $0xd0] sm:$0xff] %v563_v35  ;;  %v582_v7 = vmul.f32 %v1940_v13, %v1888_v49  ;;  %v583_v8 = vmul.f32 %v1940_v13, %v1894_v53  ;;  %v584_v9 = vmul.f32 %v1940_v13, %v1897_v54 }
 0x1a9   : > { %692 = vst [vmem:[%s1850_s12 + $0xd8] sm:$0xff] %v564_v36  ;;  %693 = vst [vmem:[%s1850_s12 + $0xe0] sm:$0xff] %v565_v43  ;;  %v512_v10 = vrot.slane %v495_v14, %v1866_v37  ;;  %v606_v11 = vmul.f32 %v1903_v57, %v1868_v38  ;;  %v607_v12 = vmul.f32 %v1903_v57, %v1870_v39 }
 0x1aa   : > { %694 = vst [vmem:[%s1850_s12 + $0xe8] sm:$0xff] %v566_v44  ;;  %695 = vst [vmem:[%s1850_s12 + $0xf0] sm:$0xff] %v567_v47  ;;  %v608_v13 = vmul.f32 %v1903_v57, %v1872_v40  ;;  %v609_v55 = vmul.f32 %v1903_v57, %v1874_v41  ;;  %v610_v14 = vmul.f32 %v1903_v57, %v1876_v42 }
 0x1ab   : > { %696 = vst [vmem:[%s1850_s12 + $0xf8] sm:$0xff] %v568_v51  ;;  %697 = vst [vmem:[%s1850_s12 + $0x100] sm:$0xff] %v569_v52  ;;  %v611_v15 = vmul.f32 %v1903_v57, %v1879_v45  ;;  %v612_v16 = vmul.f32 %v1903_v57, %v1882_v46  ;;  %v585_v17 = vmul.f32 %v512_v10, %v1853_v29 }
 0x1ac   : > { %698 = vst [vmem:[%s1850_s12 + $0x108] sm:$0xff] %v570_v56  ;;  %699 = vst [vmem:[%s1850_s12 + $0x110] sm:$0xff] %v571_v60  ;;  %v586_v18 = vmul.f32 %v512_v10, %v1855_v31  ;;  %v587_v19 = vmul.f32 %v512_v10, %v1857_v32  ;;  %v588_v20 = vmul.f32 %v512_v10, %v1859_v33 }
 0x1ad   : > { %700 = vst [vmem:[%s1850_s12 + $0x118] sm:$0xff] %v572_v61  ;;  %701 = vst [vmem:[%s1850_s12 + $0x120] sm:$0xff] %v573_v62  ;;  %v589_v21 = vmul.f32 %v512_v10, %v1861_v34  ;;  %v590_v22 = vmul.f32 %v512_v10, %v1868_v38  ;;  %v591_v23 = vmul.f32 %v512_v10, %v1870_v39 }
 0x1ae   : > { %702 = vst [vmem:[%s1850_s12 + $0x128] sm:$0xff] %v574_v63  ;;  %703 = vst [vmem:[%s1850_s12 + $0x130] sm:$0xff] %v575_v0  ;;  %v592_v24 = vmul.f32 %v512_v10, %v1872_v40  ;;  %v593_v25 = vmul.f32 %v512_v10, %v1874_v41  ;;  %v594_v26 = vmul.f32 %v512_v10, %v1876_v42 }
 0x1af   : > { %704 = vst [vmem:[%s1850_s12 + $0x138] sm:$0xff] %v576_v1  ;;  %705 = vst [vmem:[%s1850_s12 + $0x140] sm:$0xff] %v577_v2  ;;  %v595_v27 = vmul.f32 %v512_v10, %v1879_v45  ;;  %v596_v28 = vmul.f32 %v512_v10, %v1882_v46  ;;  %v597_v30 = vmul.f32 %v512_v10, %v1885_v48 }
 0x1b0   : > { %706 = vst [vmem:[%s1850_s12 + $0x148] sm:$0xff] %v578_v3  ;;  %707 = vst [vmem:[%s1850_s12 + $0x150] sm:$0xff] %v579_v4  ;;  %v598_v35 = vmul.f32 %v512_v10, %v1888_v49  ;;  %v599_v36 = vmul.f32 %v512_v10, %v1894_v53  ;;  %v600_v43 = vmul.f32 %v512_v10, %v1897_v54 }
 0x1b1   : > { %708 = vst [vmem:[%s1850_s12 + $0x158] sm:$0xff] %v580_v5  ;;  %709 = vst [vmem:[%s1850_s12 + $0x160] sm:$0xff] %v581_v6  ;;  %v613_v44 = vmul.f32 %v1903_v57, %v1885_v48  ;;  %v614_v47 = vmul.f32 %v1903_v57, %v1888_v49  ;;  %v615_v51 = vmul.f32 %v1903_v57, %v1894_v53 }
 0x1b2   : > { %710 = vst [vmem:[%s1850_s12 + $0x168] sm:$0xff] %v582_v7  ;;  %711 = vst [vmem:[%s1850_s12 + $0x170] sm:$0xff] %v583_v8  ;;  %v616_v52 = vmul.f32 %v1903_v57, %v1897_v54  ;;  %v520_v56 = vrot.slane %v1905_v58, %v1866_v37  ;;  %v524_v57 = vrot.slane %v494_v59, %v1866_v37 }
 0x1b3   : > { %712 = vst [vmem:[%s1850_s12 + $0x178] sm:$0xff] %v584_v9  ;;  %734 = vst [vmem:[%s1850_s12 + $0x228] sm:$0xff] %v606_v11  ;;  %v496_v60 = vcombine.high %v1905_v58, %v1905_v58 }
 0x1b4   : > { %735 = vst [vmem:[%s1850_s12 + $0x230] sm:$0xff] %v607_v12  ;;  %736 = vst [vmem:[%s1850_s12 + $0x238] sm:$0xff] %v608_v13  ;;  %v617_v61 = vmul.f32 %v520_v56, %v1853_v29  ;;  %v618_v62 = vmul.f32 %v520_v56, %v1855_v31  ;;  %v619_v63 = vmul.f32 %v520_v56, %v1857_v32 }
 0x1b5   : > { %737 = vst [vmem:[%s1850_s12 + $0x240] sm:$0xff] %v609_v55  ;;  %738 = vst [vmem:[%s1850_s12 + $0x248] sm:$0xff] %v610_v14  ;;  %v620_v0 = vmul.f32 %v520_v56, %v1859_v33  ;;  %v621_v1 = vmul.f32 %v520_v56, %v1861_v34  ;;  %v622_v50 = vmul.f32 %v520_v56, %v1868_v38 }
 0x1b6   : > { %739 = vst [vmem:[%s1850_s12 + $0x250] sm:$0xff] %v611_v15  ;;  %740 = vst [vmem:[%s1850_s12 + $0x258] sm:$0xff] %v612_v16  ;;  %v623_v59 = vmul.f32 %v520_v56, %v1870_v39  ;;  %v624_v58 = vmul.f32 %v520_v56, %v1872_v40  ;;  %v625_v2 = vmul.f32 %v520_v56, %v1874_v41 }
 0x1b7   : > { %713 = vst [vmem:[%s1850_s12 + $0x180] sm:$0xff] %v585_v17  ;;  %714 = vst [vmem:[%s1850_s12 + $0x188] sm:$0xff] %v586_v18  ;;  %v626_v3 = vmul.f32 %v520_v56, %v1876_v42  ;;  %v627_v4 = vmul.f32 %v520_v56, %v1879_v45  ;;  %v628_v5 = vmul.f32 %v520_v56, %v1882_v46 }
 0x1b8   : > { %715 = vst [vmem:[%s1850_s12 + $0x190] sm:$0xff] %v587_v19  ;;  %716 = vst [vmem:[%s1850_s12 + $0x198] sm:$0xff] %v588_v20  ;;  %v629_v6 = vmul.f32 %v520_v56, %v1885_v48  ;;  %v630_v7 = vmul.f32 %v520_v56, %v1888_v49  ;;  %v631_v8 = vmul.f32 %v520_v56, %v1894_v53 }
 0x1b9   : > { %717 = vst [vmem:[%s1850_s12 + $0x1a0] sm:$0xff] %v589_v21  ;;  %718 = vst [vmem:[%s1850_s12 + $0x1a8] sm:$0xff] %v590_v22  ;;  %v632_v9 = vmul.f32 %v520_v56, %v1897_v54  ;;  %v633_v10 = vmul.f32 %v524_v57, %v1853_v29  ;;  %v634_v11 = vmul.f32 %v524_v57, %v1855_v31 }
 0x1ba   : > { %719 = vst [vmem:[%s1850_s12 + $0x1b0] sm:$0xff] %v591_v23  ;;  %720 = vst [vmem:[%s1850_s12 + $0x1b8] sm:$0xff] %v592_v24  ;;  %v635_v12 = vmul.f32 %v524_v57, %v1857_v32  ;;  %v636_v13 = vmul.f32 %v524_v57, %v1859_v33  ;;  %v637_v55 = vmul.f32 %v524_v57, %v1861_v34 }
 0x1bb   : > { %721 = vst [vmem:[%s1850_s12 + $0x1c0] sm:$0xff] %v593_v25  ;;  %722 = vst [vmem:[%s1850_s12 + $0x1c8] sm:$0xff] %v594_v26  ;;  %v638_v14 = vmul.f32 %v524_v57, %v1868_v38  ;;  %v639_v15 = vmul.f32 %v524_v57, %v1870_v39  ;;  %v640_v16 = vmul.f32 %v524_v57, %v1872_v40 }
 0x1bc   : > { %723 = vst [vmem:[%s1850_s12 + $0x1d0] sm:$0xff] %v595_v27  ;;  %724 = vst [vmem:[%s1850_s12 + $0x1d8] sm:$0xff] %v596_v28  ;;  %v641_v17 = vmul.f32 %v524_v57, %v1874_v41  ;;  %v642_v18 = vmul.f32 %v524_v57, %v1876_v42  ;;  %v643_v19 = vmul.f32 %v524_v57, %v1879_v45 }
 0x1bd   : > { %725 = vst [vmem:[%s1850_s12 + $0x1e0] sm:$0xff] %v597_v30  ;;  %726 = vst [vmem:[%s1850_s12 + $0x1e8] sm:$0xff] %v598_v35  ;;  %v644_v20 = vmul.f32 %v524_v57, %v1882_v46  ;;  %v645_v21 = vmul.f32 %v524_v57, %v1885_v48  ;;  %v646_v22 = vmul.f32 %v524_v57, %v1888_v49 }
 0x1be   : > { %727 = vst [vmem:[%s1850_s12 + $0x1f0] sm:$0xff] %v599_v36  ;;  %728 = vst [vmem:[%s1850_s12 + $0x1f8] sm:$0xff] %v600_v43  ;;  %v647_v23 = vmul.f32 %v524_v57, %v1894_v53  ;;  %v648_v24 = vmul.f32 %v524_v57, %v1897_v54  ;;  %v528_v25 = vrot.slane %v496_v60, %v1866_v37 }
 0x1bf   : > { %741 = vst [vmem:[%s1850_s12 + $0x260] sm:$0xff] %v613_v44  ;;  %742 = vst [vmem:[%s1850_s12 + $0x268] sm:$0xff] %v614_v47 }
 0x1c0   : > { %743 = vst [vmem:[%s1850_s12 + $0x270] sm:$0xff] %v615_v51  ;;  %744 = vst [vmem:[%s1850_s12 + $0x278] sm:$0xff] %v616_v52  ;;  %v649_v26 = vmul.f32 %v528_v25, %v1853_v29  ;;  %v650_v27 = vmul.f32 %v528_v25, %v1855_v31  ;;  %v651_v28 = vmul.f32 %v528_v25, %v1857_v32 }
 0x1c1   : > { %745 = vst [vmem:[%s1850_s12 + $0x280] sm:$0xff] %v617_v61  ;;  %746 = vst [vmem:[%s1850_s12 + $0x288] sm:$0xff] %v618_v62  ;;  %v652_v30 = vmul.f32 %v528_v25, %v1859_v33  ;;  %v653_v35 = vmul.f32 %v528_v25, %v1861_v34  ;;  %v654_v37 = vmul.f32 %v528_v25, %v1868_v38 }
 0x1c2   : > { %747 = vst [vmem:[%s1850_s12 + $0x290] sm:$0xff] %v619_v63  ;;  %748 = vst [vmem:[%s1850_s12 + $0x298] sm:$0xff] %v620_v0  ;;  %v655_v36 = vmul.f32 %v528_v25, %v1870_v39  ;;  %v656_v43 = vmul.f32 %v528_v25, %v1872_v40  ;;  %v657_v29 = vmul.f32 %v528_v25, %v1874_v41 }
 0x1c3   : > { %749 = vst [vmem:[%s1850_s12 + $0x2a0] sm:$0xff] %v621_v1  ;;  %750 = vst [vmem:[%s1850_s12 + $0x2a8] sm:$0xff] %v622_v50  ;;  %v658_v31 = vmul.f32 %v528_v25, %v1876_v42  ;;  %v659_v32 = vmul.f32 %v528_v25, %v1879_v45  ;;  %v660_v33 = vmul.f32 %v528_v25, %v1882_v46 }
 0x1c4   : > { %751 = vst [vmem:[%s1850_s12 + $0x2b0] sm:$0xff] %v623_v59  ;;  %752 = vst [vmem:[%s1850_s12 + $0x2b8] sm:$0xff] %v624_v58  ;;  %v661_v34 = vmul.f32 %v528_v25, %v1885_v48  ;;  %v662_v38 = vmul.f32 %v528_v25, %v1888_v49  ;;  %v663_v39 = vmul.f32 %v528_v25, %v1894_v53 }
 0x1c5   : > { %753 = vst [vmem:[%s1850_s12 + $0x2c0] sm:$0xff] %v625_v2  ;;  %754 = vst [vmem:[%s1850_s12 + $0x2c8] sm:$0xff] %v626_v3  ;;  %v664_v40 = vmul.f32 %v528_v25, %v1897_v54 }
 0x1c6   : > { %755 = vst [vmem:[%s1850_s12 + $0x2d0] sm:$0xff] %v627_v4  ;;  %756 = vst [vmem:[%s1850_s12 + $0x2d8] sm:$0xff] %v628_v5 }
 0x1c7   : > { %757 = vst [vmem:[%s1850_s12 + $0x2e0] sm:$0xff] %v629_v6  ;;  %758 = vst [vmem:[%s1850_s12 + $0x2e8] sm:$0xff] %v630_v7 }
 0x1c8   : > { %759 = vst [vmem:[%s1850_s12 + $0x2f0] sm:$0xff] %v631_v8  ;;  %760 = vst [vmem:[%s1850_s12 + $0x2f8] sm:$0xff] %v632_v9 }
 0x1c9   : > { %761 = vst [vmem:[%s1850_s12 + $0x300] sm:$0xff] %v633_v10  ;;  %762 = vst [vmem:[%s1850_s12 + $0x308] sm:$0xff] %v634_v11 }
 0x1ca   : > { %763 = vst [vmem:[%s1850_s12 + $0x310] sm:$0xff] %v635_v12  ;;  %764 = vst [vmem:[%s1850_s12 + $0x318] sm:$0xff] %v636_v13 }
 0x1cb   : > { %765 = vst [vmem:[%s1850_s12 + $0x320] sm:$0xff] %v637_v55  ;;  %766 = vst [vmem:[%s1850_s12 + $0x328] sm:$0xff] %v638_v14 }
 0x1cc   : > { %767 = vst [vmem:[%s1850_s12 + $0x330] sm:$0xff] %v639_v15  ;;  %768 = vst [vmem:[%s1850_s12 + $0x338] sm:$0xff] %v640_v16 }
 0x1cd   : > { %769 = vst [vmem:[%s1850_s12 + $0x340] sm:$0xff] %v641_v17  ;;  %770 = vst [vmem:[%s1850_s12 + $0x348] sm:$0xff] %v642_v18 }
 0x1ce   : > { %771 = vst [vmem:[%s1850_s12 + $0x350] sm:$0xff] %v643_v19  ;;  %772 = vst [vmem:[%s1850_s12 + $0x358] sm:$0xff] %v644_v20 }
 0x1cf   : > { %773 = vst [vmem:[%s1850_s12 + $0x360] sm:$0xff] %v645_v21  ;;  %774 = vst [vmem:[%s1850_s12 + $0x368] sm:$0xff] %v646_v22 }
 0x1d0   : > { %775 = vst [vmem:[%s1850_s12 + $0x370] sm:$0xff] %v647_v23  ;;  %776 = vst [vmem:[%s1850_s12 + $0x378] sm:$0xff] %v648_v24 }
 0x1d1   : > { %777 = vst [vmem:[%s1850_s12 + $0x380] sm:$0xff] %v649_v26  ;;  %778 = vst [vmem:[%s1850_s12 + $0x388] sm:$0xff] %v650_v27 }
 0x1d2   : > { %779 = vst [vmem:[%s1850_s12 + $0x390] sm:$0xff] %v651_v28  ;;  %780 = vst [vmem:[%s1850_s12 + $0x398] sm:$0xff] %v652_v30 }
 0x1d3   : > { %781 = vst [vmem:[%s1850_s12 + $0x3a0] sm:$0xff] %v653_v35  ;;  %782 = vst [vmem:[%s1850_s12 + $0x3a8] sm:$0xff] %v654_v37 }
 0x1d4   : > { %783 = vst [vmem:[%s1850_s12 + $0x3b0] sm:$0xff] %v655_v36  ;;  %784 = vst [vmem:[%s1850_s12 + $0x3b8] sm:$0xff] %v656_v43  ;;  %796 = sbr.rel (%p1045_p11) target bundleno = 478 (0x1de), region = 60 }
 0x1d5   : > { %785 = vst [vmem:[%s1850_s12 + $0x3c0] sm:$0xff] %v657_v29  ;;  %786 = vst [vmem:[%s1850_s12 + $0x3c8] sm:$0xff] %v658_v31 }
 0x1d6   : > { %787 = vst [vmem:[%s1850_s12 + $0x3d0] sm:$0xff] %v659_v32  ;;  %788 = vst [vmem:[%s1850_s12 + $0x3d8] sm:$0xff] %v660_v33 }
 0x1d7   : > { %789 = vst [vmem:[%s1850_s12 + $0x3e0] sm:$0xff] %v661_v34  ;;  %790 = vst [vmem:[%s1850_s12 + $0x3e8] sm:$0xff] %v662_v38 }
 0x1d8   : > { %791 = vst [vmem:[%s1850_s12 + $0x3f0] sm:$0xff] %v663_v39  ;;  %792 = vst [vmem:[%s1850_s12 + $0x3f8] sm:$0xff] %v664_v40 }
 0x1d9   : > { %v797_v41 = vld [vmem:[#allocation2] sm:$0xff] }
 0x1da   : > { %v1046_v42 = vld [vmem:[%s290_s25] ss:$0 sm:$0xff] }
 0x1db   : > { %v805_v45 = vadd.f32 %v1046_v42, %v797_v41 }
 0x1dd   : > { %806 = vst [vmem:[%s1846_s14] sm:$0xff] %v805_v45 }
 0x1de PF: > { %s2366_s4 = sld [smem:[#allocation24_spill]]  ;;  %s826_s29 = sshll.u32 %s1846_s14, 4  ;;  %s827_s29 = int_to_ptr.vmem [resolvable:$true] %s826_s29 }
 0x1df   : > { %s2367_s8 = sld [smem:[#allocation32_spill]]  ;;  %s808_s11 = scalar_lea.sflag [#allocation5], %s1791_s18 }
 0x1e0   : > { %s1371_s17 = scalar_lea.vmem %s827_s29, 128  ;;  %s1520_s25 = smov [#allocation10]  }
 0x1e1   : > { %p1372_p2 = scmp.ne.s32.totalorder %s827_s29, %s1371_s17  ;;  %s1375_s13 = sshll.u32 %s1520_s25, 4  ;;  %s1376_s13 = int_to_ptr.vmem [resolvable:$false] %s1375_s13 }
 0x1e2   : > { %s1377_s21 = scalar_lea.vmem %s1376_s13, 256  ;;  %p1378_p10 = scmp.lt.s32.totalorder %s827_s29, %s1376_s13 }
 0x1e3   : > { %p1373_p9 = pnand %p1372_p2, %p1736_p1  ;;  %p1379_p5 = scmp.lt.s32.totalorder %s1377_s21, %s1371_s17 }
 0x1e4   : > { %s1049_s5 = sshll.u32 %s2366_s4, 7 }
 0x1e5   : > { %s824_s16 = scalar_lea.hbm %s2367_s8, %s1049_s5  ;;  %p1374_p4 = pneg %p1373_p9 }
 0x1e6   : > { %p1380_p13 = por %p1379_p5, %p1378_p10 }
 0x1e8   : > { %p1381_p8 = pnand %p1380_p13, %p1374_p4 }
 0x1ea   : > { %1384 = shalt.err (!%p1381_p8)
}
 0x1eb   : > { %s1385_s14 = scalar_lea.hbm %s824_s16, 128  ;;  %s1389_s30 = scalar_lea.hbm %s2367_s8, 256 }
 0x1ec   : > { %p1386_p12 = scmp.ne.s32.totalorder %s824_s16, %s1385_s14  ;;  %p1390_p3 = scmp.lt.s32.totalorder %s824_s16, %s2367_s8 }
 0x1ed   : > { %p1391_p7 = scmp.lt.s32.totalorder %s1389_s30, %s1385_s14 }
 0x1ee   : > { %p1387_p6 = pnand %p1386_p12, %p1736_p1 }
 0x1ef   : > { %p1392_p11 = por %p1391_p7, %p1390_p3 }
 0x1f0   : > { %p1388_p0 = pneg %p1387_p6 }
 0x1f2   : > { %p1393_p2 = pnand %p1392_p11, %p1388_p0 }
 0x1f4   : > { %1396 = shalt.err (!%p1393_p2)
}
 0x1f5   : > { %1121 = dma.vmem_to_hbm [thread:$0]  (%p1736_p1), %s827_s29, 128, %s824_s16, %s808_s11  }
 0x1f6   : > { %s813_s17 = scalar_lea.sflag [#allocation12], %s1781_s0 }
 0x1f7   : > { %s2368_s25 = sld [smem:[#allocation23_spill]]  ;;  %s1056_s21 = sshll.u32 %s2366_s4, 5 }
 0x1f8   : > { %s2369_s13 = sld [smem:[#allocation27_spill]]  ;;  %s851_s1 = sshll.u32 %s1850_s12, 4  ;;  %s852_s1 = int_to_ptr.vmem [resolvable:$true] %s851_s1 }
 0x1f9   : > { %s2370_s6 = sld [smem:[#allocation33_spill]]  ;;  %s1521_s0 = smov 2048  }
 0x1fa   : > { %s1522_s16 = smov 8192   ;;  %s1523_s11 = smov 16  }
 0x1fb   : > { %s1524_s4 = smov 128   ;;  %s1525_s12 = smov 256  }
 0x1fc   : > { %s1526_s7 = smov 8  }
 0x1fd   : > { %s838_s14 = sadd.s32 %s2368_s25, %s1056_s21  ;;  %s1527_s25 = smov 131072  }
 0x1fe   : > { %s1052_s18 = sshll.u32 %s838_s14, 7  ;;  %p2371_p1 = scmp.ne.s32.totalorder %s2369_s13, 0 }
 0x1ff   : > { %s840_s29 = scalar_lea.hbm %s2370_s6, %s1052_s18  ;;  %s1528_s21 = smov 0  }
 0x200   : > { %1122 = sst [smem:[#allocation14]] (%p2371_p1), %s1521_s0 }
 0x201   : > { %1123 = sst [smem:[#allocation14 + $0x1]] (%p2371_p1), %s1522_s16 }
 0x202   : > { %1124 = sst [smem:[#allocation14 + $0x2]] (%p2371_p1), %s1523_s11 }
 0x203   : > { %1125 = sst [smem:[#allocation14 + $0x3]] (%p2371_p1), %s1524_s4 }
 0x204   : > { %1126 = sst [smem:[#allocation14 + $0x4]] (%p2371_p1), %s1525_s12 }
 0x205   : > { %1127 = sst [smem:[#allocation14 + $0x5]] (%p2371_p1), %s1526_s7 }
 0x206   : > { %1128 = dma.general (%p2371_p1), %s852_s1, 16384, %s840_s29, %s813_s17, %s1527_s25, [#allocation14], %s1528_s21, 0  }
 0x207 PF: > { %s2372_s14 = sld [smem:[#allocation21_spill]]  ;;  %p1157_p9 = scmp.ge.s32.totalorder %s1507_s28, 2 }
 0x208   : > { %s2373_s18 = sld [smem:[#allocation28_spill]] }
 0x20d   : > { %s879_s5 = sand.u32 1, %s2372_s14  }
 0x20e   : > { %p2374_p4 = scmp.ne.s32.totalorder %s2373_s18, 0  ;;  %s880_s30 = scalar_lea.sflag [#allocation5], %s879_s5 }
 0x210   : > { %p1146_p10 = pnand %p1157_p9, %p2374_p4 }
 0x212   : > { %p1147_p5 = pneg %p1146_p10 }
 0x214   : > { %1458 = dma.done.wait (%p1147_p5), %s880_s30, 128  }
 0x215   : > { %1460 = vsyncadd (%p1147_p5), %s880_s30, 4294967168  ;;  %s2375_s6 = sld [smem:[#allocation22_spill]] }
 0x216   : > { %s2376_s0 = sld [smem:[#allocation29_spill]] }
 0x21b   : > { %s888_s16 = sand.u32 1, %s2375_s6  }
 0x21c   : > { %p2377_p13 = scmp.ne.s32.totalorder %s2376_s0, 0  ;;  %s889_s13 = scalar_lea.sflag [#allocation12], %s888_s16 }
 0x21e   : > { %p1149_p8 = pnand %p1157_p9, %p2377_p13 }
 0x220   : > { %p1150_p12 = pneg %p1149_p8 }
 0x222   : > { %1462 = dma.done.wait (%p1150_p12), %s889_s13, 16384  }
 0x223   : > { %1464 = vsyncadd (%p1150_p12), %s889_s13, 4294950912  ;;  %s24_s28 = sadd.s32 1, %s1507_s28   ;;  %s2378_s18 = smov %s1471_s19 }
 0x224   : > { %p21_p6 = scmp.ge.s32.totalorder %s24_s28, 6   ;;  %s2379_s19 = smov %s1475_s20 }
 0x225   : > { %s2380_s20 = smov %s1751_s10  ;;  %s2381_s21 = smov %s1483_s22 }
 0x226   : > { %s2382_s22 = smov %s1487_s23  ;;  %s2383_s23 = smov %s1756_s24 }
 0x227   : > { %s2384_s24 = smov %s1499_s26  ;;  %s2385_s25 = smov %s1503_s27 }
 0x228   : > { %s2386_s26 = smov %s2389_s15  ;;  %s2387_s27 = smov %s2393_s9 }
 0x229   :  { %23 = sbr.rel (!%p21_p6) target bundleno = 16 (0x10), region = 131 }
 0x22e   :  { %894 = vsyncpa [#allocation4], 1 }
 0x22f   :  { %896 = vsyncpa [#allocation4 + $0x1], 1 }
 0x230   :  { %897 = vsyncpa [#allocation7], 1 }
 0x231   :  { %898 = vsyncpa [#allocation5], 1 }
 0x232   :  { %900 = vsyncpa [#allocation5 + $0x1], 1 }
 0x233   :  { %901 = vsyncpa [#allocation12], 1 }
 0x234   :  { %903 = vsyncpa [#allocation12 + $0x1], 1 }

</bundles_post_ra>
